<compile_context>
chip_gen: v5e
topology: v5e:2x2
jax: 0.10.0
libtpu: 0.0.40
codegen_flags: <defaults>
</compile_context>

<pallas_src>
import jax
import jax.numpy as jnp
from jax.experimental import pallas as pl
from jax.experimental.pallas import tpu as pltpu


def dqn_kernel(x_ref, w1_ref, b1_ref, w2_ref, b2_ref,
               w3_ref, b3_ref, wh_ref, bh_ref, o_ref):
    # x_ref: (in_dim, TILE_B); weights: (out, in); biases: (out, 1)
    x = x_ref[...]
    # lin1 + relu
    h = jnp.dot(w1_ref[...], x, preferred_element_type=jnp.float32)
    h = jnp.maximum(h + b1_ref[...], 0.0)
    # lin2 + relu
    h = jnp.dot(w2_ref[...], h, preferred_element_type=jnp.float32)
    h = jnp.maximum(h + b2_ref[...], 0.0)
    # lin3 + relu
    h = jnp.dot(w3_ref[...], h, preferred_element_type=jnp.float32)
    h = jnp.maximum(h + b3_ref[...], 0.0)
    # head (no activation) -> lane-dense (n_out, TILE_B) store
    out = jnp.dot(wh_ref[...], h, preferred_element_type=jnp.float32)
    o_ref[...] = (out + bh_ref[...]).astype(o_ref.dtype)


def dqn_forward(x, params, *, tile_b=1024):
    """x: (B, outputs//2) f32. params: PyTorch-layout weights (out, in), biases (out, 1)."""
    B, in_dim = x.shape
    n_out = params["wh"].shape[0]

    # Pick a lane-dense batch tile (multiple of 128), no larger than needed.
    tile_b = min(tile_b, max(128, ((B + 127) // 128) * 128))
    n_blocks = pl.cdiv(B, tile_b)
    pad_b = n_blocks * tile_b

    # Layout plumbing in the wrapper: batch on the lane (last) axis.
    xT = x.T
    if pad_b != B:
        xT = jnp.pad(xT, ((0, 0), (0, pad_b - B)))

    args = (xT,
            params["w1"], params["b1"],
            params["w2"], params["b2"],
            params["w3"], params["b3"],
            params["wh"], params["bh"])

    const_spec = lambda arr: pl.BlockSpec(arr.shape, lambda i: (0, 0))

    outT = pl.pallas_call(
        dqn_kernel,
        out_shape=jax.ShapeDtypeStruct((n_out, pad_b), jnp.float32),
        grid=(n_blocks,),
        in_specs=[
            pl.BlockSpec((in_dim, tile_b), lambda i: (0, i)),   # x tile
            const_spec(params["w1"]), const_spec(params["b1"]),
            const_spec(params["w2"]), const_spec(params["b2"]),
            const_spec(params["w3"]), const_spec(params["b3"]),
            const_spec(params["wh"]), const_spec(params["bh"]),
        ],
        out_specs=pl.BlockSpec((n_out, tile_b), lambda i: (0, i)),
        compiler_params=pltpu.CompilerParams(
            dimension_semantics=("parallel",)),
    )(*args)

    return outT[:, :B].T


def init_params(key, outputs):
    """Deterministic init mirroring nn.Linear's U(-1/sqrt(fan_in), +1/sqrt(fan_in)).

    Weights stored as (out_features, in_features) (PyTorch layout);
    biases as (out_features, 1) for lane-broadcast inside the kernel.
    """
    in_dim = outputs // 2
    dims = [(in_dim, 16), (16, 32), (32, 32), (32, outputs)]
    names = ["1", "2", "3", "h"]
    params = {}
    for (fan_in, fan_out), n in zip(dims, names):
        key, kw, kb = jax.random.split(key, 3)
        bound = 1.0 / (fan_in ** 0.5)
        params["w" + n] = jax.random.uniform(
            kw, (fan_out, fan_in), jnp.float32, -bound, bound)
        params["b" + n] = jax.random.uniform(
            kb, (fan_out, 1), jnp.float32, -bound, bound)
    return params


def dqn_reference(x, params):
    h = jax.nn.relu(x @ params["w1"].T + params["b1"].T)
    h = jax.nn.relu(h @ params["w2"].T + params["b2"].T)
    h = jax.nn.relu(h @ params["w3"].T + params["b3"].T)
    return h @ params["wh"].T + params["bh"].T


if __name__ == "__main__":
    outputs = 8           # DQN(outputs=8) -> input features = outputs // 2 = 4
    batch = 2

    key = jax.random.PRNGKey(0)
    key, kx = jax.random.split(key)
    params = init_params(key, outputs)
    x = jax.random.normal(kx, (batch, outputs // 2), jnp.float32)

    out = dqn_forward(x, params)
    out = jax.block_until_ready(out)
    ref = dqn_reference(x, params)
    assert out.shape == (batch, outputs), out.shape
    assert jnp.allclose(out, ref, atol=1e-5, rtol=1e-5), "mismatch vs reference"

    # Exercise the batch grid + padding path (non-multiple of the tile size).
    key, kx2 = jax.random.split(key)
    x2 = jax.random.normal(kx2, (300, outputs // 2), jnp.float32)
    out2 = jax.block_until_ready(dqn_forward(x2, params, tile_b=128))
    ref2 = dqn_reference(x2, params)
    assert out2.shape == (300, outputs), out2.shape
    assert jnp.allclose(out2, ref2, atol=1e-5, rtol=1e-5), "mismatch vs reference (grid)"

    print("KERNEL_OK")
</pallas_src>

<mosaic_0001>
module attributes {stable_mosaic.version = 11 : i64} {
  func.func @dqn_kernel(%arg0: i32, %arg1: memref<4x128xf32, #tpu.memory_space<vmem>>, %arg2: memref<16x4xf32, #tpu.memory_space<vmem>>, %arg3: memref<16x1xf32, #tpu.memory_space<vmem>>, %arg4: memref<32x16xf32, #tpu.memory_space<vmem>>, %arg5: memref<32x1xf32, #tpu.memory_space<vmem>>, %arg6: memref<32x32xf32, #tpu.memory_space<vmem>>, %arg7: memref<32x1xf32, #tpu.memory_space<vmem>>, %arg8: memref<8x32xf32, #tpu.memory_space<vmem>>, %arg9: memref<8x1xf32, #tpu.memory_space<vmem>>, %arg10: memref<8x128xf32, #tpu.memory_space<vmem>>) attributes {dimension_semantics = [#tpu.dimension_semantics<parallel>], iteration_bounds = array<i64: 1>, scalar_prefetch = 0 : i64, scratch_operands = 0 : i64, tpu.core_type = #tpu.core_type<tc>, window_params = [{transform_indices = @transform_0, window_bounds = array<i64: 4, 128>}, {pipeline_mode = #tpu.pipeline_mode<synchronous>, transform_indices = @transform_1, window_bounds = array<i64: 16, 4>}, {pipeline_mode = #tpu.pipeline_mode<synchronous>, transform_indices = @transform_2, window_bounds = array<i64: 16, 1>}, {pipeline_mode = #tpu.pipeline_mode<synchronous>, transform_indices = @transform_3, window_bounds = array<i64: 32, 16>}, {pipeline_mode = #tpu.pipeline_mode<synchronous>, transform_indices = @transform_4, window_bounds = array<i64: 32, 1>}, {pipeline_mode = #tpu.pipeline_mode<synchronous>, transform_indices = @transform_5, window_bounds = array<i64: 32, 32>}, {pipeline_mode = #tpu.pipeline_mode<synchronous>, transform_indices = @transform_6, window_bounds = array<i64: 32, 1>}, {pipeline_mode = #tpu.pipeline_mode<synchronous>, transform_indices = @transform_7, window_bounds = array<i64: 8, 32>}, {pipeline_mode = #tpu.pipeline_mode<synchronous>, transform_indices = @transform_8, window_bounds = array<i64: 8, 1>}, {transform_indices = @transform_9, window_bounds = array<i64: 8, 128>}]} {
    %c0 = arith.constant 0 : index
    %c0_0 = arith.constant 0 : index
    %0 = vector.load %arg1[%c0, %c0_0] : memref<4x128xf32, #tpu.memory_space<vmem>>, vector<4x128xf32>
    %c0_1 = arith.constant 0 : index
    %c0_2 = arith.constant 0 : index
    %1 = vector.load %arg2[%c0_1, %c0_2] : memref<16x4xf32, #tpu.memory_space<vmem>>, vector<16x4xf32>
    %cst = arith.constant dense<0.000000e+00> : vector<16x128xf32>
    %2 = tpu.matmul %1, %0, %cst {dimension_numbers = #tpu.dot_dimension_numbers<[1], [0], [0], [1], [0, 0, 1, 1], [], []>} : vector<16x4xf32>, vector<4x128xf32>, vector<16x128xf32> -> vector<16x128xf32>
    %c0_3 = arith.constant 0 : index
    %c0_4 = arith.constant 0 : index
    %3 = vector.load %arg3[%c0_3, %c0_4] : memref<16x1xf32, #tpu.memory_space<vmem>>, vector<16x1xf32>
    %4 = vector.broadcast %3 : vector<16x1xf32> to vector<16x128xf32>
    %5 = arith.addf %2, %4 : vector<16x128xf32>
    %cst_5 = arith.constant 0.000000e+00 : f32
    %6 = vector.broadcast %cst_5 : f32 to vector<16x128xf32>
    %7 = arith.maximumf %5, %6 : vector<16x128xf32>
    %c0_6 = arith.constant 0 : index
    %c0_7 = arith.constant 0 : index
    %8 = vector.load %arg4[%c0_6, %c0_7] : memref<32x16xf32, #tpu.memory_space<vmem>>, vector<32x16xf32>
    %cst_8 = arith.constant dense<0.000000e+00> : vector<32x128xf32>
    %9 = tpu.matmul %8, %7, %cst_8 {dimension_numbers = #tpu.dot_dimension_numbers<[1], [0], [0], [1], [0, 0, 1, 1], [], []>} : vector<32x16xf32>, vector<16x128xf32>, vector<32x128xf32> -> vector<32x128xf32>
    %c0_9 = arith.constant 0 : index
    %c0_10 = arith.constant 0 : index
    %10 = vector.load %arg5[%c0_9, %c0_10] : memref<32x1xf32, #tpu.memory_space<vmem>>, vector<32x1xf32>
    %11 = vector.broadcast %10 : vector<32x1xf32> to vector<32x128xf32>
    %12 = arith.addf %9, %11 : vector<32x128xf32>
    %cst_11 = arith.constant 0.000000e+00 : f32
    %13 = vector.broadcast %cst_11 : f32 to vector<32x128xf32>
    %14 = arith.maximumf %12, %13 : vector<32x128xf32>
    %c0_12 = arith.constant 0 : index
    %c0_13 = arith.constant 0 : index
    %15 = vector.load %arg6[%c0_12, %c0_13] : memref<32x32xf32, #tpu.memory_space<vmem>>, vector<32x32xf32>
    %cst_14 = arith.constant dense<0.000000e+00> : vector<32x128xf32>
    %16 = tpu.matmul %15, %14, %cst_14 {dimension_numbers = #tpu.dot_dimension_numbers<[1], [0], [0], [1], [0, 0, 1, 1], [], []>} : vector<32x32xf32>, vector<32x128xf32>, vector<32x128xf32> -> vector<32x128xf32>
    %c0_15 = arith.constant 0 : index
    %c0_16 = arith.constant 0 : index
    %17 = vector.load %arg7[%c0_15, %c0_16] : memref<32x1xf32, #tpu.memory_space<vmem>>, vector<32x1xf32>
    %18 = vector.broadcast %17 : vector<32x1xf32> to vector<32x128xf32>
    %19 = arith.addf %16, %18 : vector<32x128xf32>
    %cst_17 = arith.constant 0.000000e+00 : f32
    %20 = vector.broadcast %cst_17 : f32 to vector<32x128xf32>
    %21 = arith.maximumf %19, %20 : vector<32x128xf32>
    %c0_18 = arith.constant 0 : index
    %c0_19 = arith.constant 0 : index
    %22 = vector.load %arg8[%c0_18, %c0_19] : memref<8x32xf32, #tpu.memory_space<vmem>>, vector<8x32xf32>
    %cst_20 = arith.constant dense<0.000000e+00> : vector<8x128xf32>
    %23 = tpu.matmul %22, %21, %cst_20 {dimension_numbers = #tpu.dot_dimension_numbers<[1], [0], [0], [1], [0, 0, 1, 1], [], []>} : vector<8x32xf32>, vector<32x128xf32>, vector<8x128xf32> -> vector<8x128xf32>
    %c0_21 = arith.constant 0 : index
    %c0_22 = arith.constant 0 : index
    %24 = vector.load %arg9[%c0_21, %c0_22] : memref<8x1xf32, #tpu.memory_space<vmem>>, vector<8x1xf32>
    %25 = vector.broadcast %24 : vector<8x1xf32> to vector<8x128xf32>
    %26 = arith.addf %23, %25 : vector<8x128xf32>
    %c0_23 = arith.constant 0 : index
    %c0_24 = arith.constant 0 : index
    %27 = vector.load %arg10[%c0_23, %c0_24] : memref<8x128xf32, #tpu.memory_space<vmem>>, vector<8x128xf32>
    tpu.vector_store %arg10[%c0_23, %c0_24], %26 {strides = array<i32>} : memref<8x128xf32, #tpu.memory_space<vmem>>, vector<8x128xf32>,
    return
  }
  func.func @transform_0(%arg0: i32) -> (i32, i32) {
    %c0_i32 = arith.constant 0 : i32
    %c0_i32_0 = arith.constant 0 : i32
    return %c0_i32, %arg0 : i32, i32
  }
  func.func @transform_1(%arg0: i32) -> (i32, i32) {
    %c0_i32 = arith.constant 0 : i32
    %c0_i32_0 = arith.constant 0 : i32
    %c0_i32_1 = arith.constant 0 : i32
    return %c0_i32, %c0_i32_0 : i32, i32
  }
  func.func @transform_2(%arg0: i32) -> (i32, i32) {
    %c0_i32 = arith.constant 0 : i32
    %c0_i32_0 = arith.constant 0 : i32
    %c0_i32_1 = arith.constant 0 : i32
    return %c0_i32, %c0_i32_0 : i32, i32
  }
  func.func @transform_3(%arg0: i32) -> (i32, i32) {
    %c0_i32 = arith.constant 0 : i32
    %c0_i32_0 = arith.constant 0 : i32
    %c0_i32_1 = arith.constant 0 : i32
    return %c0_i32, %c0_i32_0 : i32, i32
  }
  func.func @transform_4(%arg0: i32) -> (i32, i32) {
    %c0_i32 = arith.constant 0 : i32
    %c0_i32_0 = arith.constant 0 : i32
    %c0_i32_1 = arith.constant 0 : i32
    return %c0_i32, %c0_i32_0 : i32, i32
  }
  func.func @transform_5(%arg0: i32) -> (i32, i32) {
    %c0_i32 = arith.constant 0 : i32
    %c0_i32_0 = arith.constant 0 : i32
    %c0_i32_1 = arith.constant 0 : i32
    return %c0_i32, %c0_i32_0 : i32, i32
  }
  func.func @transform_6(%arg0: i32) -> (i32, i32) {
    %c0_i32 = arith.constant 0 : i32
    %c0_i32_0 = arith.constant 0 : i32
    %c0_i32_1 = arith.constant 0 : i32
    return %c0_i32, %c0_i32_0 : i32, i32
  }
  func.func @transform_7(%arg0: i32) -> (i32, i32) {
    %c0_i32 = arith.constant 0 : i32
    %c0_i32_0 = arith.constant 0 : i32
    %c0_i32_1 = arith.constant 0 : i32
    return %c0_i32, %c0_i32_0 : i32, i32
  }
  func.func @transform_8(%arg0: i32) -> (i32, i32) {
    %c0_i32 = arith.constant 0 : i32
    %c0_i32_0 = arith.constant 0 : i32
    %c0_i32_1 = arith.constant 0 : i32
    return %c0_i32, %c0_i32_0 : i32, i32
  }
  func.func @transform_9(%arg0: i32) -> (i32, i32) {
    %c0_i32 = arith.constant 0 : i32
    %c0_i32_0 = arith.constant 0 : i32
    return %c0_i32, %arg0 : i32, i32
  }
}

</mosaic_0001>

<bundles_post_ra>
// kernel: tpu_custom_call.1
= control target key start
LH: loop header
LB: loop body
LE: loop exit
PB: predicated region body
PF: predicated region fallthrough
CT: control target
= control target key end

     0   :  { %vm55_vm0 = vcmask 1043456   ;;  %v328_v3 = vmov 0   ;;  %vm48_vm1 = vcmask 31744   ;;  %s457_s0 = inlined_call_operand.vmem [shape: f32[4,128], index: 0, kind: input, shape index: {}]   ;;  %s458_s1 = inlined_call_operand.vmem [shape: f32[16,4], index: 1, kind: input, shape index: {}]   ;;  %s459_s2 = inlined_call_operand.vmem [shape: f32[16,1], index: 2, kind: input, shape index: {}]   ;;  %s460_s3 = inlined_call_operand.vmem [shape: f32[32,16], index: 3, kind: input, shape index: {}]   ;;  %s461_s4 = inlined_call_operand.vmem [shape: f32[32,1], index: 4, kind: input, shape index: {}]   ;;  %s462_s5 = inlined_call_operand.vmem [shape: f32[32,32], index: 5, kind: input, shape index: {}]   ;;  %s463_s6 = inlined_call_operand.vmem [shape: f32[32,1], index: 6, kind: input, shape index: {}]   ;;  %s464_s7 = inlined_call_operand.vmem [shape: f32[8,32], index: 7, kind: input, shape index: {}]   ;;  %s465_s8 = inlined_call_operand.vmem [shape: f32[8,1], index: 8, kind: input, shape index: {}]   ;;  %s466_s9 = inlined_call_operand.hbm [shape: f32[8,128], index: 9, kind: output, shape index: {}]  }
   0x1   :  { %v33_v0 = vld [vmem:[%s457_s0] sm:$0xf]  ;;  %v37_v1 = vld [vmem:[%s459_s2 + $0x8] sm:$0xff]  ;;  %299 = vset.pattern.permute.xlu0 %v328_v3 }
   0x2   :  { %v34_v2 = vld [vmem:[%s458_s1] sm:$0xff]  ;;  %279 = vmatpush.msk.msra.mxu0 %vm55_vm0, %v33_v0  ;;  %45 = vperm.xlu0 %299, %v37_v1  }
   0x3   :  { %280 = vmatmul.msk.f32.vlgmr.msra.gmra.mxu0 %vm48_vm1, %v34_v2 }
   0x4   :  { %14 = vsyncpa [#allocation3], 0  ;;  %300 = vset.pattern.permute.xlu1 %v328_v3  ;;  %301 = vset.pattern.permute.xlu2 %v328_v3  ;;  %v36_v4 = vld [vmem:[%s459_s2] sm:$0xff]  ;;  %v35_v5 = vld [vmem:[%s458_s1 + $0x8] sm:$0xff]  ;;  %vm112_vm2 = vcmask 130048   ;;  %vm186_vm3 = vcmask 261120  }
   0x5   :  { %v165_v6 = vld [vmem:[%s463_s6 + $0x18] sm:$0xff]  ;;  %v162_v7 = vld [vmem:[%s463_s6] sm:$0xff]  ;;  %v90_v9 = vld [vmem:[%s461_s4 + $0x10] sm:$0xff]  ;;  %s329_s24 = smov [#allocation2]   ;;  %s270_s27 = sshll.u32 %s466_s9, 4  ;;  %s271_s27 = int_to_ptr.hbm [resolvable:$true] %s270_s27 }
   0x6   :  { %v91_v8 = vld [vmem:[%s461_s4 + $0x18] sm:$0xff]  ;;  %v164_v10 = vld [vmem:[%s463_s6 + $0x10] sm:$0xff]  ;;  %v89_v13 = vld [vmem:[%s461_s4 + $0x8] sm:$0xff]  ;;  %s268_s1 = sshll.u32 %s329_s24, 4  ;;  %s269_s1 = int_to_ptr.vmem [resolvable:$true] %s268_s1 }
   0x7   :  { %109 = vperm.xlu1 %300, %v91_v8   ;;  %v233_v14 = vld [vmem:[%s465_s8] sm:$0xff]  ;;  %99 = vperm.xlu2 %301, %v89_v13   ;;  %v85_v22 = vld [vmem:[%s460_s3 + $0x8] sm:$0xff]  ;;  %v86_v25 = vld [vmem:[%s460_s3 + $0x10] sm:$0xff] }
   0x8   :  { %v88_v15 = vld [vmem:[%s461_s4] sm:$0xff]  ;;  %v163_v24 = vld [vmem:[%s463_s6 + $0x8] sm:$0xff]  ;;  %v87_v26 = vld [vmem:[%s460_s3 + $0x18] sm:$0xff] }
   0x9   :  { %v84_v23 = vld [vmem:[%s460_s3] sm:$0xff]  ;;  %v161_v44 = vld [vmem:[%s462_s5 + $0x18] sm:$0xff]  ;;  %v159_v45 = vld [vmem:[%s462_s5 + $0x8] sm:$0xff] }
   0xa   :  { %40 = vperm.xlu0 %299, %v36_v4   ;;  %v158_v43 = vld [vmem:[%s462_s5] sm:$0xff]  ;;  %v160_v46 = vld [vmem:[%s462_s5 + $0x10] sm:$0xff] }
   0xb   :  { %281 = vmatmul.msk.f32.gmra.mxu0 %vm48_vm1, %v35_v5  ;;  %v232_v63 = vld [vmem:[%s464_s7] sm:$0xff] }
   0xf   :  { %104 = vperm.xlu1 %300, %v90_v9   ;;  %94 = vperm.xlu2 %301, %v88_v15  }
  0x12   :  { %183 = vperm.xlu0 %299, %v165_v6  }
  0x17   :  { %178 = vperm.xlu1 %300, %v164_v10   ;;  %173 = vperm.xlu2 %301, %v163_v24  }
  0x1a   :  { %168 = vperm.xlu0 %299, %v162_v7  }
  0x1f   :  { %236 = vperm.xlu1 %300, %v233_v14  }
  0x61   :  { %v100_v30 = vpop.permute.xlu2 %99 }
  0x69   :  { %v95_v38 = vpop.permute.xlu2 %94 }
  0x71   :  { %v174_v54 = vpop.permute.xlu2 %173 }
  0x74   :  { %v46_v11 = vpop.permute.xlu0 %45 }
  0x79   :  { %v110_v28 = vpop.permute.xlu1 %109 }
  0x7c   :  { %v41_v16 = vpop.permute.xlu0 %40 }
  0x80   :  { %v76_v12 = vpop.f32.mrf.mxu0 }
  0x81   :  { %v77_v18 = vadd.f32 %v76_v12, %v41_v16  ;;  %v105_v31 = vpop.permute.xlu1 %104 }
  0x83   :  { %v82_v21 = vmax.f32 %v77_v18, 0.0 }
  0x84   :  { %v184_v47 = vpop.permute.xlu0 %183 }
  0x88   :  { %v79_v17 = vpop.f32.mrf.mxu0 }
  0x89   :  { %v80_v19 = vadd.f32 %v79_v17, %v46_v11  ;;  %v179_v53 = vpop.permute.xlu1 %178 }
  0x8b   :  { %v83_v20 = vmax.f32 %v80_v19, 0.0 }
  0x8c   :  { %v169_v58 = vpop.permute.xlu0 %168 }
  0x8d   :  { %139 = vmatpush.msrb.mxu0 %v83_v20  ;;  %291 = vmatpush.msra.mxu1 %v83_v20 }
  0x8f   :  { %140 = vmatpush.msrb.mxu0 %v82_v21  ;;  %292 = vmatpush.msra.mxu1 %v82_v21 }
  0x90   :  { %283 = vmatmul.msk.f32.vlgmr.msra.gmra.mxu1 %vm112_vm2, %v85_v22  ;;  %282 = vmatmul.msk.f32.vlgmr.msrb.gmra.mxu0 %vm112_vm2, %v84_v23 }
  0x91   :  { %v237_v0 = vpop.permute.xlu1 %236 }
  0x98   :  { %284 = vmatmul.msk.f32.gmra.mxu1 %vm112_vm2, %v86_v25 }
  0xa0   :  { %285 = vmatmul.msk.f32.gmra.mxu1 %vm112_vm2, %v87_v26 }
 0x10d   :  { %v145_v27 = vpop.f32.mrf.mxu1  ;;  %v142_v35 = vpop.f32.mrf.mxu0 }
 0x10e   :  { %v146_v36 = vadd.f32 %v145_v27, %v100_v30  ;;  %v143_v40 = vadd.f32 %v142_v35, %v95_v38 }
 0x110   :  { %v155_v41 = vmax.f32 %v146_v36, 0.0  ;;  %v154_v42 = vmax.f32 %v143_v40, 0.0 }
 0x115   :  { %v148_v29 = vpop.f32.mrf.mxu1 }
 0x116   :  { %v149_v33 = vadd.f32 %v148_v29, %v105_v31 }
 0x118   :  { %v156_v39 = vmax.f32 %v149_v33, 0.0 }
 0x11d   :  { %v151_v32 = vpop.f32.mrf.mxu1 }
 0x11e   :  { %v152_v34 = vadd.f32 %v151_v32, %v110_v28 }
 0x120   :  { %v157_v37 = vmax.f32 %v152_v34, 0.0 }
 0x122   :  { %211 = vmatpush.msra.mxu2 %v157_v37  ;;  %293 = vmatpush.msra.mxu3 %v157_v37 }
 0x124   :  { %212 = vmatpush.msra.mxu2 %v156_v39  ;;  %294 = vmatpush.msra.mxu3 %v156_v39 }
 0x126   :  { %213 = vmatpush.msra.mxu2 %v155_v41  ;;  %295 = vmatpush.msra.mxu3 %v155_v41 }
 0x128   :  { %214 = vmatpush.msra.mxu2 %v154_v42  ;;  %296 = vmatpush.msra.mxu3 %v154_v42 }
 0x129   :  { %286 = vmatmul.msk.f32.vlgmr.msra.gmra.mxu2 %vm186_vm3, %v158_v43  ;;  %289 = vmatmul.msk.f32.vlgmr.msra.gmra.mxu3 %vm186_vm3, %v161_v44 }
 0x131   :  { %287 = vmatmul.msk.f32.gmra.mxu2 %vm186_vm3, %v159_v45 }
 0x139   :  { %288 = vmatmul.msk.f32.gmra.mxu2 %vm186_vm3, %v160_v46 }
 0x1ac   :  { %v216_v48 = vpop.f32.mrf.mxu2  ;;  %v225_v49 = vpop.f32.mrf.mxu3 }
 0x1ad   :  { %v226_v50 = vadd.f32 %v225_v49, %v184_v47  ;;  %v217_v59 = vadd.f32 %v216_v48, %v169_v58 }
 0x1af   :  { %v231_v51 = vmax.f32 %v226_v50, 0.0  ;;  %v228_v62 = vmax.f32 %v217_v59, 0.0 }
 0x1b1   :  { %254 = vmatpush.msrb.mxu3 %v231_v51 }
 0x1b4   :  { %v219_v52 = vpop.f32.mrf.mxu2 }
 0x1b5   :  { %v220_v56 = vadd.f32 %v219_v52, %v174_v54 }
 0x1b7   :  { %v229_v61 = vmax.f32 %v220_v56, 0.0 }
 0x1bc   :  { %v222_v55 = vpop.f32.mrf.mxu2 }
 0x1bd   :  { %v223_v57 = vadd.f32 %v222_v55, %v179_v53 }
 0x1bf   :  { %v230_v60 = vmax.f32 %v223_v57, 0.0 }
 0x1c1   :  { %255 = vmatpush.msrb.mxu3 %v230_v60 }
 0x1c3   :  { %256 = vmatpush.msrb.mxu3 %v229_v61 }
 0x1c5   :  { %257 = vmatpush.msrb.mxu3 %v228_v62 }
 0x1c6   :  { %290 = vmatmul.msk.f32.vlgmr.msrb.gmra.mxu3 %vm186_vm3, %v232_v63 }
 0x249   :  { %v259_v1 = vpop.f32.mrf.mxu3 }
 0x24a   :  { %v260_v2 = vadd.f32 %v259_v1, %v237_v0 }
 0x24c   :  { %262 = vst [vmem:[#allocation2] sm:$0xff] %v260_v2 }
 0x24d   :  { %273 = dma.vmem_to_hbm [thread:$0]  %s269_s1, 128, %s271_s27, [#allocation3]  }
 0x24e   :  { %326 = dma.done.wait [#allocation3], 128  }
 0x24f   :  { %327 = vsyncadd [#allocation3], 4294967168 }
 0x250   :  { %278 = vsyncpa [#allocation3], 1 }

</bundles_post_ra>
